<compile_context>
chip_gen: v7x
topology: tpu7x:2x2x1
jax: 0.10.0
libtpu: 0.0.40
codegen_flags: <defaults>
</compile_context>

<pallas_src>
import math
import functools

import jax
import jax.numpy as jnp
from jax.experimental import pallas as pl
from jax.experimental.pallas import tpu as pltpu


# ----------------------------- Pallas kernels ------------------------------

def _pe_add_eval_kernel(x_ref, pe_ref, o_ref):
    # (TILE_ROWS, LANE) + (1, LANE) broadcast add on the VPU.
    o_ref[...] = x_ref[...] + pe_ref[...]


def _pe_add_dropout_kernel(x_ref, pe_ref, bits_ref, o_ref, *, threshold, scale):
    # Integer-threshold keep test: P(bits >= threshold) == 1 - p.
    y = x_ref[...] + pe_ref[...]
    keep = bits_ref[...] >= jnp.uint32(threshold)
    o_ref[...] = jnp.where(keep, y * scale, jnp.zeros_like(y))


# ----------------------------- layout helpers -------------------------------

def _lane_dense_2d(x):
    """Flatten (B, S, D) to a lane-dense (rows, lane) slab.

    Returns (x2d, lane, rep) where lane == rep * D.  When D < 128 and things
    divide evenly, `rep` consecutive (b, s) rows are folded into one 2D row so
    the output's last dim is a multiple of 128 (unmasked vector stores).
    """
    B, S, D = x.shape
    rows = B * S
    if D % 128 == 0:
        return x.reshape(rows, D), D, 1
    if 128 % D == 0:
        rep = 128 // D
        if rows % rep == 0:
            return x.reshape(rows // rep, D * rep), D * rep, rep
    return x.reshape(rows, D), D, 1


def _choose_tile_rows(rows, lane, itemsize, target_bytes=2 * 1024 * 1024):
    """Row-tile sized for ~2 MiB per buffer: fits double-buffered in+out within the
    default scoped VMEM on v5e (16 MiB) / v6e (32 MiB) / v7x (32 MiB of 64 MiB)."""
    if rows <= 8:
        return rows
    cap = max(8, target_bytes // max(lane * itemsize, 1))
    tile = min(rows, cap, 1024)
    if tile >= rows:
        return rows
    return max(8, (tile // 8) * 8)


# ------------------------------ module wrapper ------------------------------

class PositionalEncoding:
    """JAX/Pallas port of the PyTorch PositionalEncoding module."""

    def __init__(self, d_model, dropout=0.1, max_len=100):
        self.p = float(dropout)
        self.max_len = int(max_len)
        position = jnp.arange(0, max_len, dtype=jnp.float32)[:, None]            # (max_len, 1)
        div_term = jnp.exp(
            jnp.arange(0, d_model, 2, dtype=jnp.float32) * (-math.log(10000.0) / d_model)
        )                                                                         # (d_model/2,)
        pe = jnp.zeros((max_len, d_model), dtype=jnp.float32)
        pe = pe.at[:, 0::2].set(jnp.sin(position * div_term))
        pe = pe.at[:, 1::2].set(jnp.cos(position * div_term))
        self.pe = pe[None]                                                        # (1, max_len, d_model)
        self._pe_cache = {}   # (S, rep, lane, dtype) -> (1, lane) slab in target dtype

    def _pe_slab(self, S, rep, lane, dtype):
        key = (S, rep, lane, jnp.dtype(dtype).name)
        slab = self._pe_cache.get(key)
        if slab is None:
            row = self.pe[:, S, :].astype(dtype)            # (1, D): single row at index S
            slab = jnp.tile(row, (1, rep)).reshape(1, lane)
            self._pe_cache[key] = slab
        return slab

    def __call__(self, x, training=False, seed=0):
        B, S, D = x.shape
        assert S < self.max_len, "pe[:, x.shape[1], :] requires seq_len < max_len"

        x2d, lane, rep = _lane_dense_2d(x)
        rows = x2d.shape[0]
        itemsize = jnp.dtype(x.dtype).itemsize
        tile_rows = _choose_tile_rows(rows, lane, itemsize)
        grid = (pl.cdiv(rows, tile_rows),)

        pe_slab = self._pe_slab(S, rep, lane, x.dtype)

        x_spec = pl.BlockSpec((tile_rows, lane), lambda i: (i, 0))
        pe_spec = pl.BlockSpec((1, lane), lambda i: (0, 0))          # resident pe row
        out_spec = pl.BlockSpec((tile_rows, lane), lambda i: (i, 0))
        out_shape = jax.ShapeDtypeStruct((rows, lane), x.dtype)
        cparams = pltpu.CompilerParams(dimension_semantics=("parallel",))

        if (not training) or self.p == 0.0:
            # nn.Dropout is identity in eval mode (or when p == 0).
            cost = pl.CostEstimate(
                flops=rows * lane,
                transcendentals=0,
                bytes_accessed=2 * rows * lane * itemsize,
            )
            y2d = pl.pallas_call(
                _pe_add_eval_kernel,
                out_shape=out_shape,
                grid=grid,
                in_specs=[x_spec, pe_spec],
                out_specs=out_spec,
                compiler_params=cparams,
                cost_estimate=cost,
            )(x2d, pe_slab)
            return y2d.reshape(B, S, D)

        # Training path: dropout.  Random bits are drawn host-side so the kernel stays
        # portable (no TPU-only PRNG primitives inside the kernel body).
        # TODO(synk): on real TPU, switch to in-kernel pltpu.prng_random_bits with a
        # per-tile seed (seed + pl.program_id(0)) to avoid streaming bits from HBM.
        bits = jax.random.bits(jax.random.PRNGKey(seed), shape=(rows, lane),
                               dtype=jnp.uint32)
        threshold = min(int(round(self.p * float(2 ** 32))), 2 ** 32 - 1)
        scale = 1.0 / (1.0 - self.p)
        kern = functools.partial(_pe_add_dropout_kernel, threshold=threshold, scale=scale)
        bits_spec = pl.BlockSpec((tile_rows, lane), lambda i: (i, 0))
        cost = pl.CostEstimate(
            flops=3 * rows * lane,
            transcendentals=0,
            bytes_accessed=(2 * itemsize + 4) * rows * lane,
        )
        y2d = pl.pallas_call(
            kern,
            out_shape=out_shape,
            grid=grid,
            in_specs=[x_spec, pe_spec, bits_spec],
            out_specs=out_spec,
            compiler_params=cparams,
            cost_estimate=cost,
        )(x2d, pe_slab, bits)
        return y2d.reshape(B, S, D)


# ----------------------------------- main -----------------------------------

if __name__ == "__main__":
    B, S, D = 2, 8, 32          # batch, seq_len, d_model (S < max_len=100)
    key = jax.random.PRNGKey(0)
    x = jax.random.normal(key, (B, S, D), dtype=jnp.float32)

    module = PositionalEncoding(d_model=D, dropout=0.1, max_len=100)

    # Eval-mode forward (deterministic): x + pe[:, S, :]
    out = jax.block_until_ready(module(x, training=False))
    ref = x + module.pe[:, S, :][:, None, :]
    assert out.shape == x.shape and out.dtype == x.dtype
    assert jnp.allclose(out, ref, atol=1e-6, rtol=1e-6)

    # Training (dropout) path: every element must be either 0 or ref/(1-p).
    out_tr = jax.block_until_ready(module(x, training=True, seed=123))
    assert out_tr.shape == x.shape and out_tr.dtype == x.dtype
    scale = 1.0 / (1.0 - module.p)
    ok = jnp.isclose(out_tr, 0.0) | jnp.isclose(out_tr, ref * scale, atol=1e-5, rtol=1e-5)
    assert bool(jnp.all(ok))

    print("KERNEL_OK")
</pallas_src>

<mosaic_0001>
module attributes {stable_mosaic.version = 11 : i64} {
  func.func @_pe_add_eval_kernel(%arg0: i32, %arg1: memref<4x128xf32, #tpu.memory_space<vmem>>, %arg2: memref<1x128xf32, #tpu.memory_space<vmem>>, %arg3: memref<4x128xf32, #tpu.memory_space<vmem>>) attributes {dimension_semantics = [#tpu.dimension_semantics<parallel>], iteration_bounds = array<i64: 1>, scalar_prefetch = 0 : i64, scratch_operands = 0 : i64, tpu.core_type = #tpu.core_type<tc>, window_params = [{transform_indices = @transform_0, window_bounds = array<i64: 4, 128>}, {pipeline_mode = #tpu.pipeline_mode<synchronous>, transform_indices = @transform_1, window_bounds = array<i64: 1, 128>}, {transform_indices = @transform_2, window_bounds = array<i64: 4, 128>}]} {
    %c0 = arith.constant 0 : index
    %c0_0 = arith.constant 0 : index
    %0 = vector.load %arg1[%c0, %c0_0] : memref<4x128xf32, #tpu.memory_space<vmem>>, vector<4x128xf32>
    %c0_1 = arith.constant 0 : index
    %c0_2 = arith.constant 0 : index
    %1 = vector.load %arg2[%c0_1, %c0_2] : memref<1x128xf32, #tpu.memory_space<vmem>>, vector<1x128xf32>
    %2 = vector.broadcast %1 : vector<1x128xf32> to vector<4x128xf32>
    %3 = arith.addf %0, %2 : vector<4x128xf32>
    %c0_3 = arith.constant 0 : index
    %c0_4 = arith.constant 0 : index
    %4 = vector.load %arg3[%c0_3, %c0_4] : memref<4x128xf32, #tpu.memory_space<vmem>>, vector<4x128xf32>
    tpu.vector_store %arg3[%c0_3, %c0_4], %3 {strides = array<i32>} : memref<4x128xf32, #tpu.memory_space<vmem>>, vector<4x128xf32>,
    return
  }
  func.func @transform_0(%arg0: i32) -> (i32, i32) {
    %c0_i32 = arith.constant 0 : i32
    %c0_i32_0 = arith.constant 0 : i32
    return %arg0, %c0_i32 : i32, i32
  }
  func.func @transform_1(%arg0: i32) -> (i32, i32) {
    %c0_i32 = arith.constant 0 : i32
    %c0_i32_0 = arith.constant 0 : i32
    %c0_i32_1 = arith.constant 0 : i32
    return %c0_i32, %c0_i32_0 : i32, i32
  }
  func.func @transform_2(%arg0: i32) -> (i32, i32) {
    %c0_i32 = arith.constant 0 : i32
    %c0_i32_0 = arith.constant 0 : i32
    return %arg0, %c0_i32 : i32, i32
  }
}

</mosaic_0001>

<bundles_post_ra>
// kernel: tpu_custom_call.1
= control target key start
LH: loop header
LB: loop body
LE: loop exit
PB: predicated region body
PF: predicated region fallthrough
CT: control target
= control target key end

     0   :  { %7 = vsyncpa [#allocation3], 0  ;;  %s144_s0 = inlined_call_operand.hbm [shape: f32[4,128], index: 0, kind: input, shape index: {}]   ;;  %s145_s1 = inlined_call_operand.vmem [shape: f32[1,128], index: 1, kind: input, shape index: {}]   ;;  %s146_s2 = inlined_call_operand.hbm [shape: f32[4,128], index: 2, kind: output, shape index: {}]  }
   0x1   :  { %8 = vsyncpa [#allocation4], 0  ;;  %s100_s9 = smov [#allocation2]   ;;  %s52_s13 = scalar_lea.hbm %s144_s0, 64 }
   0x2   :  { %s15_s10 = sshll.u32 %s100_s9, 4  ;;  %p53_p0 = scmp.ne.s32.totalorder %s144_s0, %s52_s13  ;;  %s16_s10 = int_to_ptr.vmem [resolvable:$true] %s15_s10 }
   0x3   :  { %p56_p1 = scmp.lt.u32.totalorder %s52_s13, %s144_s0 }
   0x5   :  { %p58_p2 = pnand %p56_p1, %p53_p0 }
   0x7   :  { %61 = shalt.err (!%p58_p2)
}
   0x8   :  { %s62_s18 = scalar_lea.vmem %s16_s10, 64  ;;  %p67_p4 = scmp.lt.s32.totalorder %s16_s10, %s16_s10 }
   0x9   :  { %p63_p3 = scmp.ne.s32.totalorder %s16_s10, %s62_s18  ;;  %p68_p5 = scmp.lt.s32.totalorder %s62_s18, %s62_s18 }
   0xb   :  { %p69_p6 = por %p68_p5, %p67_p4 }
   0xd   :  { %p70_p7 = pnand %p69_p6, %p63_p3 }
   0xf   :  { %73 = shalt.err (!%p70_p7)
}
  0x10   :  { %18 = dma.hbm_to_vmem [thread:$0]  %s144_s0, 64, %s16_s10, [#allocation3]  }
  0x11   :  { %96 = dma.done.wait [#allocation3], 64  }
  0x12   :  { %97 = vsyncadd [#allocation3], 4294967232  ;;  %s101_s21 = smov [#allocation5]   ;;  %v24_v0 = vld [vmem:[#allocation2] sm:$0xf] }
  0x13   :  { %s40_s22 = sshll.u32 %s101_s21, 4  ;;  %v49_v1 = vld [vmem:[%s145_s1] ss:$0 sm:$0xff]  ;;  %s41_s22 = int_to_ptr.vmem [resolvable:$true] %s40_s22 }
  0x14   :  { %v32_v2 = vadd.f32 %v49_v1, %v24_v0  ;;  %s74_s25 = scalar_lea.vmem %s41_s22, 64  ;;  %p79_p9 = scmp.lt.s32.totalorder %s41_s22, %s41_s22 }
  0x15   :  { %p75_p8 = scmp.ne.s32.totalorder %s41_s22, %s74_s25  ;;  %p80_p10 = scmp.lt.s32.totalorder %s74_s25, %s74_s25 }
  0x16   :  { %33 = vst [vmem:[#allocation5] sm:$0xf] %v32_v2 }
  0x17   :  { %p81_p11 = por %p80_p10, %p79_p9 }
  0x19   :  { %p82_p12 = pnand %p81_p11, %p75_p8 }
  0x1b   :  { %85 = shalt.err (!%p82_p12)
}
  0x1c   :  { %s86_s27 = scalar_lea.hbm %s146_s2, 64 }
  0x1d   :  { %p87_p13 = scmp.ne.s32.totalorder %s146_s2, %s86_s27  ;;  %p90_p0 = scmp.lt.u32.totalorder %s86_s27, %s146_s2 }
  0x1f   :  { %p92_p1 = pnand %p90_p0, %p87_p13 }
  0x21   :  { %95 = shalt.err (!%p92_p1)
}
  0x22   :  { %43 = dma.vmem_to_hbm [thread:$0]  %s41_s22, 64, %s146_s2, [#allocation4]  }
  0x23   :  { %98 = dma.done.wait [#allocation4], 64  }
  0x24   :  { %99 = vsyncadd [#allocation4], 4294967232 }
  0x25   :  { %47 = vsyncpa [#allocation3], 1 }
  0x26   :  { %48 = vsyncpa [#allocation4], 1 }

</bundles_post_ra>
